<compile_context>
chip_gen: v7x
topology: tpu7x:2x2x1
jax: 0.10.0
libtpu: 0.0.40
codegen_flags: <defaults>
</compile_context>

<pallas_src>
import functools

import jax
import jax.numpy as jnp
from jax.experimental import pallas as pl
from jax.experimental.pallas import tpu as pltpu

LANE = 128


def _round_up(n, m):
    return ((n + m - 1) // m) * m


def ppo_kernel(x_ref, w1_ref, b1_ref, wh_ref, bh_ref,
               policy_ref, value_ref, *, num_actions, policy_lanes):
    x = x_ref[...]

    # fc1 + ReLU  (MXU matmul with f32 accumulation; elementwise math in f32)
    h = jnp.dot(x, w1_ref[...], preferred_element_type=jnp.float32) + b1_ref[...]
    h = jnp.maximum(h, 0.0).astype(wh_ref.dtype)

    # Fused heads: one matmul produces [policy_lanes | value_lanes].
    heads = jnp.dot(h, wh_ref[...], preferred_element_type=jnp.float32) + bh_ref[...]

    # Policy head: logits padded to 128 lanes; mask padded lanes before softmax.
    logits = heads[:, :policy_lanes]
    lane = jax.lax.broadcasted_iota(jnp.int32, logits.shape, dimension=1)
    logits = jnp.where(lane < num_actions, logits, -1e30)
    m = jnp.max(logits, axis=-1, keepdims=True)
    e = jnp.exp(logits - m)
    policy_ref[...] = (e / jnp.sum(e, axis=-1, keepdims=True)).astype(policy_ref.dtype)

    # Value head: real output in lane 0 of its 128-lane padded block.
    value_ref[...] = heads[:, policy_lanes:].astype(value_ref.dtype)


def ppo_forward(x, params, *, compute_dtype=jnp.float32, block_b=512):
    """x: [B, input_size]. Returns (policy [B, output_size], value [B, 1])."""
    w1, b1 = params["w1_pad"], params["b1_pad"]
    wh, bh = params["wh_pad"], params["bh_pad"]
    num_actions = params["num_actions"]
    policy_lanes = params["policy_lanes"]

    B, F = x.shape
    Hp = w1.shape[1]          # padded hidden (multiple of 128)
    T = wh.shape[1]           # policy_lanes + value_lanes (multiple of 128)
    P = policy_lanes
    V = T - P

    # Matmul operands in compute_dtype (e.g. bf16 on v6e/v7x); biases stay f32.
    xc = x.astype(compute_dtype)
    w1c, whc = w1.astype(compute_dtype), wh.astype(compute_dtype)
    b1f, bhf = b1.astype(jnp.float32), bh.astype(jnp.float32)

    # Batch tile: full batch if small, otherwise a sublane-aligned tile.
    tb = B if B <= block_b else _round_up(block_b, 8)
    grid = (pl.cdiv(B, tb),)

    kernel = functools.partial(ppo_kernel, num_actions=num_actions,
                               policy_lanes=policy_lanes)

    policy_pad, value_pad = pl.pallas_call(
        kernel,
        out_shape=(jax.ShapeDtypeStruct((B, P), jnp.float32),
                   jax.ShapeDtypeStruct((B, V), jnp.float32)),
        grid=grid,
        in_specs=[
            pl.BlockSpec((tb, F), lambda i: (i, 0)),    # x: tiled over batch
            pl.BlockSpec((F, Hp), lambda i: (0, 0)),    # weights/biases: VMEM-resident
            pl.BlockSpec((1, Hp), lambda i: (0, 0)),
            pl.BlockSpec((Hp, T), lambda i: (0, 0)),
            pl.BlockSpec((1, T), lambda i: (0, 0)),
        ],
        out_specs=(pl.BlockSpec((tb, P), lambda i: (i, 0)),
                   pl.BlockSpec((tb, V), lambda i: (i, 0))),
        compiler_params=pltpu.CompilerParams(
            dimension_semantics=("parallel",)),
    )(xc, w1c, b1f, whc, bhf)

    # Slice the lane padding back off outside the kernel.
    return policy_pad[:, :num_actions], value_pad[:, :1]


def init_ppo_params(key, input_size, hidden_size, output_size):
    """PyTorch-style uniform init. Weights stored transposed [in, out]. Hidden dim
    and head outputs are zero-padded to lane multiples; both heads are fused into
    one padded weight/bias."""
    ks = jax.random.split(key, 6)

    def linear(kw, kb, fan_in, fan_out):
        bound = 1.0 / jnp.sqrt(fan_in)
        w = jax.random.uniform(kw, (fan_in, fan_out), jnp.float32, -bound, bound)
        b = jax.random.uniform(kb, (1, fan_out), jnp.float32, -bound, bound)
        return w, b

    w1, b1 = linear(ks[0], ks[1], input_size, hidden_size)
    wp, bp = linear(ks[2], ks[3], hidden_size, output_size)   # fc_policy
    wv, bv = linear(ks[4], ks[5], hidden_size, 1)             # fc_value

    Hp = _round_up(hidden_size, LANE)
    P = _round_up(max(output_size, 1), LANE)
    V = LANE

    w1_pad = jnp.zeros((input_size, Hp), jnp.float32).at[:, :hidden_size].set(w1)
    b1_pad = jnp.zeros((1, Hp), jnp.float32).at[:, :hidden_size].set(b1)

    # Fused heads: [policy (P lanes) | value (V lanes)].
    wh_pad = jnp.zeros((Hp, P + V), jnp.float32)
    wh_pad = wh_pad.at[:hidden_size, :output_size].set(wp)
    wh_pad = wh_pad.at[:hidden_size, P:P + 1].set(wv)
    bh_pad = jnp.zeros((1, P + V), jnp.float32)
    bh_pad = bh_pad.at[:, :output_size].set(bp)
    bh_pad = bh_pad.at[:, P:P + 1].set(bv)

    return {"w1": w1, "b1": b1, "wp": wp, "bp": bp, "wv": wv, "bv": bv,
            "w1_pad": w1_pad, "b1_pad": b1_pad,
            "wh_pad": wh_pad, "bh_pad": bh_pad,
            "num_actions": output_size, "policy_lanes": P}


def ppo_reference(x, p):
    """Plain-JAX reference of PPONetwork.forward (policy softmax, value)."""
    h = jnp.maximum(x @ p["w1"] + p["b1"], 0.0)
    policy = jax.nn.softmax(h @ p["wp"] + p["bp"], axis=-1)
    value = h @ p["wv"] + p["bv"]
    return policy, value


if __name__ == "__main__":
    key = jax.random.PRNGKey(0)
    k_param, k_x, k_x2 = jax.random.split(key, 3)

    input_size, hidden_size, output_size = 16, 64, 4
    params = init_ppo_params(k_param, input_size, hidden_size, output_size)

    # Small f32 check — exact semantics of the PyTorch module's forward.
    batch = 2
    x = jax.random.normal(k_x, (batch, input_size), dtype=jnp.float32)
    policy, value = jax.block_until_ready(ppo_forward(x, params))
    policy_ref, value_ref = ppo_reference(x, params)
    assert policy.shape == (batch, output_size) and value.shape == (batch, 1)
    assert jnp.allclose(policy, policy_ref, atol=1e-5, rtol=1e-5), "policy mismatch (f32)"
    assert jnp.allclose(value, value_ref, atol=1e-5, rtol=1e-5), "value mismatch (f32)"

    # Larger batch in bf16 exercises the batch grid / parallel axis / bf16 MXU path.
    big_b = 1024
    xb = jax.random.normal(k_x2, (big_b, input_size), dtype=jnp.float32)
    policy_b, value_b = jax.block_until_ready(
        ppo_forward(xb, params, compute_dtype=jnp.bfloat16, block_b=512))
    policy_br, value_br = ppo_reference(xb, params)
    assert jnp.allclose(policy_b, policy_br, atol=3e-2, rtol=3e-2), "policy mismatch (bf16)"
    assert jnp.allclose(value_b, value_br, atol=3e-2, rtol=3e-2), "value mismatch (bf16)"

    print("KERNEL_OK")
</pallas_src>

<mosaic_0001>
module attributes {stable_mosaic.version = 11 : i64} {
  func.func @ppo_kernel(%arg0: i32, %arg1: memref<2x16xf32, #tpu.memory_space<vmem>>, %arg2: memref<16x128xf32, #tpu.memory_space<vmem>>, %arg3: memref<1x128xf32, #tpu.memory_space<vmem>>, %arg4: memref<128x256xf32, #tpu.memory_space<vmem>>, %arg5: memref<1x256xf32, #tpu.memory_space<vmem>>, %arg6: memref<2x128xf32, #tpu.memory_space<vmem>>, %arg7: memref<2x128xf32, #tpu.memory_space<vmem>>) attributes {dimension_semantics = [#tpu.dimension_semantics<parallel>], iteration_bounds = array<i64: 1>, scalar_prefetch = 0 : i64, scratch_operands = 0 : i64, tpu.core_type = #tpu.core_type<tc>, window_params = [{transform_indices = @transform_0, window_bounds = array<i64: 2, 16>}, {pipeline_mode = #tpu.pipeline_mode<synchronous>, transform_indices = @transform_1, window_bounds = array<i64: 16, 128>}, {pipeline_mode = #tpu.pipeline_mode<synchronous>, transform_indices = @transform_2, window_bounds = array<i64: 1, 128>}, {pipeline_mode = #tpu.pipeline_mode<synchronous>, transform_indices = @transform_3, window_bounds = array<i64: 128, 256>}, {pipeline_mode = #tpu.pipeline_mode<synchronous>, transform_indices = @transform_4, window_bounds = array<i64: 1, 256>}, {transform_indices = @transform_5, window_bounds = array<i64: 2, 128>}, {transform_indices = @transform_6, window_bounds = array<i64: 2, 128>}]} {
    %c0 = arith.constant 0 : index
    %c0_0 = arith.constant 0 : index
    %0 = vector.load %arg1[%c0, %c0_0] : memref<2x16xf32, #tpu.memory_space<vmem>>, vector<2x16xf32>
    %c0_1 = arith.constant 0 : index
    %c0_2 = arith.constant 0 : index
    %1 = vector.load %arg2[%c0_1, %c0_2] : memref<16x128xf32, #tpu.memory_space<vmem>>, vector<16x128xf32>
    %cst = arith.constant dense<0.000000e+00> : vector<2x128xf32>
    %2 = tpu.matmul %0, %1, %cst {dimension_numbers = #tpu.dot_dimension_numbers<[1], [0], [0], [1], [0, 0, 1, 1], [], []>} : vector<2x16xf32>, vector<16x128xf32>, vector<2x128xf32> -> vector<2x128xf32>
    %c0_3 = arith.constant 0 : index
    %c0_4 = arith.constant 0 : index
    %3 = vector.load %arg3[%c0_3, %c0_4] : memref<1x128xf32, #tpu.memory_space<vmem>>, vector<1x128xf32>
    %4 = vector.broadcast %3 : vector<1x128xf32> to vector<2x128xf32>
    %5 = arith.addf %2, %4 : vector<2x128xf32>
    %cst_5 = arith.constant 0.000000e+00 : f32
    %6 = vector.broadcast %cst_5 : f32 to vector<2x128xf32>
    %7 = arith.maximumf %5, %6 : vector<2x128xf32>
    %c0_6 = arith.constant 0 : index
    %c0_7 = arith.constant 0 : index
    %8 = vector.load %arg4[%c0_6, %c0_7] : memref<128x256xf32, #tpu.memory_space<vmem>>, vector<128x256xf32>
    %cst_8 = arith.constant dense<0.000000e+00> : vector<2x256xf32>
    %9 = tpu.matmul %7, %8, %cst_8 {dimension_numbers = #tpu.dot_dimension_numbers<[1], [0], [0], [1], [0, 0, 1, 1], [], []>} : vector<2x128xf32>, vector<128x256xf32>, vector<2x256xf32> -> vector<2x256xf32>
    %c0_9 = arith.constant 0 : index
    %c0_10 = arith.constant 0 : index
    %10 = vector.load %arg5[%c0_9, %c0_10] : memref<1x256xf32, #tpu.memory_space<vmem>>, vector<1x256xf32>
    %11 = vector.broadcast %10 : vector<1x256xf32> to vector<2x256xf32>
    %12 = arith.addf %9, %11 : vector<2x256xf32>
    %13 = vector.extract_strided_slice %12 {offsets = [0, 0], sizes = [2, 128], strides = [1, 1]} : vector<2x256xf32> to vector<2x128xf32>
    %14 = tpu.iota {dimensions = array<i32: 1>} : vector<2x128xi32>
    %c4_i32 = arith.constant 4 : i32
    %15 = vector.broadcast %c4_i32 : i32 to vector<2x128xi32>
    %16 = arith.cmpi slt, %14, %15 : vector<2x128xi32>
    %cst_11 = arith.constant -1.000000e+30 : f32
    %17 = vector.broadcast %cst_11 : f32 to vector<2x128xf32>
    %18 = arith.select %16, %13, %17 : vector<2x128xi1>, vector<2x128xf32>
    %cst_12 = arith.constant dense<0xFF800000> : vector<2xf32>
    %19 = vector.multi_reduction <maximumf>, %18, %cst_12 [1] : vector<2x128xf32> to vector<2xf32>
    %20 = vector.shape_cast %19 : vector<2xf32> to vector<2x1xf32>
    %21 = vector.broadcast %20 : vector<2x1xf32> to vector<2x128xf32>
    %22 = arith.subf %18, %21 : vector<2x128xf32>
    %23 = math.exp %22 : vector<2x128xf32>
    %cst_13 = arith.constant dense<0.000000e+00> : vector<2xf32>
    %24 = vector.multi_reduction <add>, %23, %cst_13 [1] : vector<2x128xf32> to vector<2xf32>
    %25 = vector.shape_cast %24 : vector<2xf32> to vector<2x1xf32>
    %26 = vector.broadcast %25 : vector<2x1xf32> to vector<2x128xf32>
    %27 = arith.divf %23, %26 : vector<2x128xf32>
    %c0_14 = arith.constant 0 : index
    %c0_15 = arith.constant 0 : index
    %28 = vector.load %arg6[%c0_14, %c0_15] : memref<2x128xf32, #tpu.memory_space<vmem>>, vector<2x128xf32>
    tpu.vector_store %arg6[%c0_14, %c0_15], %27 {strides = array<i32>} : memref<2x128xf32, #tpu.memory_space<vmem>>, vector<2x128xf32>,
    %29 = vector.extract_strided_slice %12 {offsets = [0, 128], sizes = [2, 128], strides = [1, 1]} : vector<2x256xf32> to vector<2x128xf32>
    %c0_16 = arith.constant 0 : index
    %c0_17 = arith.constant 0 : index
    %30 = vector.load %arg7[%c0_16, %c0_17] : memref<2x128xf32, #tpu.memory_space<vmem>>, vector<2x128xf32>
    tpu.vector_store %arg7[%c0_16, %c0_17], %29 {strides = array<i32>} : memref<2x128xf32, #tpu.memory_space<vmem>>, vector<2x128xf32>,
    return
  }
  func.func @transform_0(%arg0: i32) -> (i32, i32) {
    %c0_i32 = arith.constant 0 : i32
    %c0_i32_0 = arith.constant 0 : i32
    return %arg0, %c0_i32 : i32, i32
  }
  func.func @transform_1(%arg0: i32) -> (i32, i32) {
    %c0_i32 = arith.constant 0 : i32
    %c0_i32_0 = arith.constant 0 : i32
    %c0_i32_1 = arith.constant 0 : i32
    return %c0_i32, %c0_i32_0 : i32, i32
  }
  func.func @transform_2(%arg0: i32) -> (i32, i32) {
    %c0_i32 = arith.constant 0 : i32
    %c0_i32_0 = arith.constant 0 : i32
    %c0_i32_1 = arith.constant 0 : i32
    return %c0_i32, %c0_i32_0 : i32, i32
  }
  func.func @transform_3(%arg0: i32) -> (i32, i32) {
    %c0_i32 = arith.constant 0 : i32
    %c0_i32_0 = arith.constant 0 : i32
    %c0_i32_1 = arith.constant 0 : i32
    return %c0_i32, %c0_i32_0 : i32, i32
  }
  func.func @transform_4(%arg0: i32) -> (i32, i32) {
    %c0_i32 = arith.constant 0 : i32
    %c0_i32_0 = arith.constant 0 : i32
    %c0_i32_1 = arith.constant 0 : i32
    return %c0_i32, %c0_i32_0 : i32, i32
  }
  func.func @transform_5(%arg0: i32) -> (i32, i32) {
    %c0_i32 = arith.constant 0 : i32
    %c0_i32_0 = arith.constant 0 : i32
    return %arg0, %c0_i32 : i32, i32
  }
  func.func @transform_6(%arg0: i32) -> (i32, i32) {
    %c0_i32 = arith.constant 0 : i32
    %c0_i32_0 = arith.constant 0 : i32
    return %arg0, %c0_i32 : i32, i32
  }
}

</mosaic_0001>

<bundles_post_ra>
// kernel: tpu_custom_call.1
= control target key start
LH: loop header
LB: loop body
LE: loop exit
PB: predicated region body
PF: predicated region fallthrough
CT: control target
= control target key end

     0   :  { %12 = vsyncpa [#allocation3], 0  ;;  %s605_s0 = inlined_call_operand.hbm [shape: f32[2,16], index: 0, kind: input, shape index: {}]   ;;  %s606_s1 = inlined_call_operand.hbm [shape: f32[16,128], index: 1, kind: input, shape index: {}]   ;;  %s607_s2 = inlined_call_operand.vmem [shape: f32[1,128], index: 2, kind: input, shape index: {}]   ;;  %s608_s3 = inlined_call_operand.hbm [shape: f32[128,256], index: 3, kind: input, shape index: {}]   ;;  %s609_s4 = inlined_call_operand.vmem [shape: f32[1,256], index: 4, kind: input, shape index: {}]   ;;  %s610_s5 = inlined_call_operand.hbm [shape: f32[2,128], index: 5, kind: output, shape index: {0}]   ;;  %s611_s6 = inlined_call_operand.hbm [shape: f32[2,128], index: 6, kind: output, shape index: {1}]  }
   0x1   :  { %13 = vsyncpa [#allocation6], 0 }
   0x2   :  { %14 = vsyncpa [#allocation4], 0 }
   0x3   :  { %15 = vsyncpa [#allocation10], 0  ;;  %s492_s21 = smov [#allocation5]   ;;  %s374_s25 = scalar_lea.hbm %s606_s1, 256 }
   0x4   :  { %s31_s22 = sshll.u32 %s492_s21, 4  ;;  %p375_p0 = scmp.ne.s32.totalorder %s606_s1, %s374_s25  ;;  %s32_s22 = int_to_ptr.vmem [resolvable:$true] %s31_s22 }
   0x5   :  { %p378_p1 = scmp.lt.u32.totalorder %s374_s25, %s606_s1 }
   0x7   :  { %p380_p2 = pnand %p378_p1, %p375_p0 }
   0x9   :  { %383 = shalt.err (!%p380_p2)
}
   0xa   :  { %s384_s30 = scalar_lea.vmem %s32_s22, 256  ;;  %p389_p4 = scmp.lt.s32.totalorder %s32_s22, %s32_s22 }
   0xb   :  { %p385_p3 = scmp.ne.s32.totalorder %s32_s22, %s384_s30  ;;  %p390_p5 = scmp.lt.s32.totalorder %s384_s30, %s384_s30 }
   0xd   :  { %p391_p6 = por %p390_p5, %p389_p4 }
   0xf   :  { %p392_p7 = pnand %p391_p6, %p385_p3 }
  0x11   :  { %395 = shalt.err (!%p392_p7)
}
  0x12   :  { %s493_s7 = smov 128   ;;  %s494_s8 = smov 8  }
  0x13   :  { %37 = dma.hbm_to_vmem [thread:$0]  %s606_s1, 256, %s32_s22, [#allocation6], %s493_s7, %s493_s7, %s494_s8  }
  0x14   :  { %s495_s11 = smov [#allocation2]   ;;  %s496_s13 = smov [#allocation7]  }
  0x15   :  { %s22_s12 = sshll.u32 %s495_s11, 4  ;;  %s45_s14 = sshll.u32 %s496_s13, 4  ;;  %s23_s12 = int_to_ptr.vmem [resolvable:$true] %s22_s12  ;;  %s46_s14 = int_to_ptr.vmem [resolvable:$true] %s45_s14 }
  0x16   :  { %s396_s17 = scalar_lea.hbm %s605_s0, 32 }
  0x17   :  { %p397_p8 = scmp.ne.s32.totalorder %s605_s0, %s396_s17  ;;  %p400_p9 = scmp.lt.u32.totalorder %s396_s17, %s605_s0 }
  0x19   :  { %p402_p10 = pnand %p400_p9, %p397_p8 }
  0x1b   :  { %405 = shalt.err (!%p402_p10)
}
  0x1c   :  { %s406_s1 = scalar_lea.vmem %s23_s12, 32  ;;  %p411_p12 = scmp.lt.s32.totalorder %s23_s12, %s23_s12 }
  0x1d   :  { %p407_p11 = scmp.ne.s32.totalorder %s23_s12, %s406_s1  ;;  %p412_p13 = scmp.lt.s32.totalorder %s406_s1, %s406_s1 }
  0x1f   :  { %p413_p0 = por %p412_p13, %p411_p12 }
  0x21   :  { %p414_p1 = pnand %p413_p0, %p407_p11 }
  0x23   :  { %417 = shalt.err (!%p414_p1)
}
  0x24   :  { %25 = dma.hbm_to_vmem [thread:$0]  %s605_s0, 32, %s23_s12, [#allocation3]  }
  0x25   :  { %s418_s26 = scalar_lea.hbm %s608_s3, 4096 }
  0x26   :  { %p419_p2 = scmp.ne.s32.totalorder %s608_s3, %s418_s26  ;;  %p422_p3 = scmp.lt.u32.totalorder %s418_s26, %s608_s3 }
  0x28   :  { %p424_p4 = pnand %p422_p3, %p419_p2 }
  0x2a   :  { %427 = shalt.err (!%p424_p4)
}
  0x2b   :  { %s428_s7 = scalar_lea.vmem %s46_s14, 4096  ;;  %p433_p6 = scmp.lt.s32.totalorder %s46_s14, %s46_s14 }
  0x2c   :  { %p429_p5 = scmp.ne.s32.totalorder %s46_s14, %s428_s7  ;;  %p434_p7 = scmp.lt.s32.totalorder %s428_s7, %s428_s7 }
  0x2e   :  { %p435_p8 = por %p434_p7, %p433_p6 }
  0x30   :  { %p436_p9 = pnand %p435_p8, %p429_p5 }
  0x32   :  { %439 = shalt.err (!%p436_p9)
}
  0x33   :  { %s497_s0 = smov 256   ;;  %s498_s8 = smov 16  }
  0x34   :  { %51 = dma.hbm_to_vmem [thread:$0]  %s608_s3, 4096, %s46_s14, [#allocation6], %s497_s0, %s497_s0, %s498_s8  }
  0x35   :  { %484 = dma.done.wait [#allocation3], 32  }
  0x36   :  { %485 = vsyncadd [#allocation3], 4294967264 }
  0x37   :  { %486 = dma.done.wait [#allocation6], 4352  }
  0x38   :  { %487 = vsyncadd [#allocation6], 4294962944  ;;  %v499_v0 = vmov 0.0|0.0   ;;  %vm500_vm0 = vmmov 0   ;;  %v501_v1 = vmov 0.0   ;;  %v64_v2 = vld [vmem:[#allocation5] sm:$0xff]  ;;  %v182_v59 = vlaneseq }
  0x39   :  { %323 = vmatprep.subr.bf16.mxu0 %v499_v0  ;;  %320 = vmatprep.mubr.msk.f32.mxu0 %vm500_vm0, %v501_v1  ;;  %v65_v3 = vld [vmem:[#allocation5 + $0x8] sm:$0xff]  ;;  %v63_v5 = vld [vmem:[#allocation2] sm:$0x3]  ;;  %v148_v8 = vld [vmem:[#allocation7] sm:$0xff]  ;;  %vm73_vm1 = vcmask 130048   ;;  %vm267_vm3 = vcmask 1041408  }
  0x3a   :  { %256 = vmatprep.mubr.f32.mxu1 %v501_v1  ;;  %v324_v4 = vpack.c.bf16 %v65_v3, %v64_v2  ;;  %v149_v6 = vld [vmem:[#allocation7 + $0x8] sm:$0xff]  ;;  %v151_v7 = vld [vmem:[#allocation7 + $0x18] sm:$0xff]  ;;  %v150_v10 = vld [vmem:[#allocation7 + $0x10] sm:$0xff]  ;;  %v183_v60 = vshrl.u32 %v182_v59, 7  ;;  %v264_v0 = vand.u32 127, %v182_v59 }
  0x3b   :  { %v326_v9 = vpack.c.bf16 %v151_v7, %v149_v6  ;;  %v153_v11 = vld [vmem:[#allocation7 + $0x28] sm:$0xff]  ;;  %v155_v12 = vld [vmem:[#allocation7 + $0x38] sm:$0xff]  ;;  %v328_v13 = vpack.c.bf16 %v150_v10, %v148_v8  ;;  %v152_v15 = vld [vmem:[#allocation7 + $0x20] sm:$0xff] }
  0x3c   :  { %325 = vmatpush3.bf16.msra.mxu0 %v324_v4  ;;  %v330_v14 = vpack.c.bf16 %v155_v12, %v153_v11  ;;  %v154_v16 = vld [vmem:[#allocation7 + $0x30] sm:$0xff]  ;;  %v157_v17 = vld [vmem:[#allocation7 + $0x48] sm:$0xff]  ;;  %v159_v18 = vld [vmem:[#allocation7 + $0x58] sm:$0xff]  ;;  %v184_v61 = vsub.s32 0, %v183_v60  ;;  %v188_v63 = vsub.s32 1, %v183_v60  ;;  %vm265_vm2 = vcmp.lt.s32.totalorder %v264_v0, 4 }
  0x3d   :  { %327 = vmatprep.subr.bf16.mxu1 %v326_v9  ;;  %v332_v19 = vpack.c.bf16 %v154_v16, %v152_v15  ;;  %v334_v20 = vpack.c.bf16 %v159_v18, %v157_v17  ;;  %v156_v21 = vld [vmem:[#allocation7 + $0x40] sm:$0xff]  ;;  %v158_v22 = vld [vmem:[#allocation7 + $0x50] sm:$0xff]  ;;  %v161_v23 = vld [vmem:[#allocation7 + $0x68] sm:$0xff] }
  0x3e   :  { %329 = vmatpush1.bf16.msra.mxu1 %v328_v13  ;;  %v163_v24 = vld [vmem:[#allocation7 + $0x78] sm:$0xff]  ;;  %v336_v25 = vpack.c.bf16 %v158_v22, %v156_v21  ;;  %v160_v27 = vld [vmem:[#allocation7 + $0x60] sm:$0xff]  ;;  %v162_v28 = vld [vmem:[#allocation7 + $0x70] sm:$0xff] }
  0x3f   :  { %321 = vmatmul.mubr.msk.f32.vlgmr.msra.gmra.mrb[0].mxu0 %vm73_vm1, %v63_v5  ;;  %331 = vmatprep.subr.bf16.mxu1 %v330_v14  ;;  %v338_v26 = vpack.c.bf16 %v163_v24, %v161_v23  ;;  %v165_v29 = vld [vmem:[#allocation7 + $0x88] sm:$0xff]  ;;  %v167_v30 = vld [vmem:[#allocation7 + $0x98] sm:$0xff]  ;;  %v340_v31 = vpack.c.bf16 %v162_v28, %v160_v27  ;;  %v164_v33 = vld [vmem:[#allocation7 + $0x80] sm:$0xff] }
  0x40   :  { %v342_v32 = vpack.c.bf16 %v167_v30, %v165_v29  ;;  %v166_v34 = vld [vmem:[#allocation7 + $0x90] sm:$0xff]  ;;  %v169_v35 = vld [vmem:[#allocation7 + $0xa8] sm:$0xff]  ;;  %v171_v36 = vld [vmem:[#allocation7 + $0xb8] sm:$0xff] }
  0x41   :  { %v344_v37 = vpack.c.bf16 %v166_v34, %v164_v33  ;;  %v346_v38 = vpack.c.bf16 %v171_v36, %v169_v35  ;;  %v168_v39 = vld [vmem:[#allocation7 + $0xa0] sm:$0xff]  ;;  %v170_v40 = vld [vmem:[#allocation7 + $0xb0] sm:$0xff]  ;;  %v173_v41 = vld [vmem:[#allocation7 + $0xc8] sm:$0xff] }
  0x42   :  { %333 = vmatpush1.bf16.msra.mxu1 %v332_v19  ;;  %v175_v42 = vld [vmem:[#allocation7 + $0xd8] sm:$0xff]  ;;  %v348_v43 = vpack.c.bf16 %v170_v40, %v168_v39  ;;  %v172_v45 = vld [vmem:[#allocation7 + $0xc0] sm:$0xff]  ;;  %v174_v46 = vld [vmem:[#allocation7 + $0xd0] sm:$0xff] }
  0x43   :  { %335 = vmatprep.subr.bf16.mxu1 %v334_v20  ;;  %v350_v44 = vpack.c.bf16 %v175_v42, %v173_v41  ;;  %v352_v47 = vpack.c.bf16 %v174_v46, %v172_v45  ;;  %v177_v48 = vld [vmem:[#allocation7 + $0xe8] sm:$0xff]  ;;  %v179_v49 = vld [vmem:[#allocation7 + $0xf8] sm:$0xff]  ;;  %v176_v51 = vld [vmem:[#allocation7 + $0xe0] sm:$0xff] }
  0x44   :  { %v354_v50 = vpack.c.bf16 %v179_v49, %v177_v48  ;;  %v178_v52 = vld [vmem:[#allocation7 + $0xf0] sm:$0xff]  ;;  %v311_v54 = vld [vmem:[%s607_s2] ss:$0 sm:$0xff]  ;;  %s502_s2 = smov [#allocation9]  }
  0x45   :  { %v356_v53 = vpack.c.bf16 %v178_v52, %v176_v51  ;;  %v180_v62 = vld [vmem:[%s609_s4] sm:$0x3]  ;;  %s297_s4 = sshll.u32 %s502_s2, 4  ;;  %s298_s4 = int_to_ptr.vmem [resolvable:$true] %s297_s4 }
  0x46   :  { %337 = vmatpush1.bf16.msra.mxu1 %v336_v25  ;;  %v185_v1 = vrot.slane %v180_v62, %v184_v61  ;;  %v189_v2 = vrot.slane %v180_v62, %v188_v63  ;;  %s440_s14 = scalar_lea.vmem %s298_s4, 32  ;;  %p445_p11 = scmp.lt.s32.totalorder %s298_s4, %s298_s4 }
  0x47   :  { %339 = vmatprep.subr.bf16.mxu1 %v338_v26  ;;  %p441_p10 = scmp.ne.s32.totalorder %s298_s4, %s440_s14  ;;  %p446_p12 = scmp.lt.s32.totalorder %s440_s14, %s440_s14 }
  0x49   :  { %p447_p13 = por %p446_p12, %p445_p11 }
  0x4a   :  { %341 = vmatpush1.bf16.msra.mxu1 %v340_v31 }
  0x4b   :  { %343 = vmatprep.subr.bf16.mxu1 %v342_v32  ;;  %p448_p0 = pnand %p447_p13, %p441_p10 }
  0x4e   :  { %345 = vmatpush1.bf16.msra.mxu1 %v344_v37 }
  0x4f   :  { %347 = vmatprep.subr.bf16.mxu1 %v346_v38 }
  0x52   :  { %349 = vmatpush1.bf16.msra.mxu1 %v348_v43 }
  0x53   :  { %351 = vmatprep.subr.bf16.mxu1 %v350_v44 }
  0x56   :  { %353 = vmatpush1.bf16.msra.mxu1 %v352_v47 }
  0x57   :  { %355 = vmatprep.subr.bf16.mxu1 %v354_v50 }
  0x5a   :  { %357 = vmatpush1.bf16.msra.mxu1 %v356_v53 }
 0x112   :  { %v143_v55 = vpop.f32.mrb[0].mxu0 }
 0x113   :  { %v144_v56 = vadd.f32 %v311_v54, %v143_v55  ;;  %v322_v57 = vpop.f32.mrb[1].mxu0 }
 0x115   :  { %v147_v58 = vmax.f32 %v144_v56, 0.0 }
 0x117   :  { %257 = vmatmul.mubr.f32.vlgmr.msra.gmra.mrb[0].mxu1 %v147_v58 }
 0x1ea   :  { %v258_v3 = vpop.f32.mrb[0].mxu1 }
 0x1eb   :  { %v259_v4 = vadd.f32 %v258_v3, %v185_v1  ;;  %v260_v5 = vpop.f32.mrb[1].mxu1 }
 0x1ec   :  { %v261_v6 = vadd.f32 %v260_v5, %v189_v2 }
 0x1ed   :  { %v266_v7 = vsel %vm265_vm2, %v259_v4, -1e+30 }
 0x1ee   :  { %280 = vst [vmem:[#allocation9] sm:$0x3] %v261_v6  ;;  %v268_v8 = vsel %vm267_vm3, %v266_v7, -inf }
 0x1ef   :  { %269 = vmax.xlane.f32.xlu0 %v268_v8 }
 0x27c   :  { %v270_v9 = vpop.xlane.xlu0 %269 }
 0x27d   :  { %v271_v10 = vsub.f32 %v266_v7, %v270_v9 }
 0x27f   :  { %v272_v11 = vmul.f32 1.442695, %v271_v10 }
 0x281   :  { %370 = vpow2.f32 %v272_v11 }
 0x28b   :  { %v371_v12 = vpop.eup %370 }
 0x28c   :  { %v274_v13 = vsel %vm267_vm3, %v371_v12, 0.0 }
 0x28d   :  { %275 = vadd.xlane.f32.xlu0 %v274_v13 }
 0x28e   :  { %451 = shalt.err (!%p448_p0)
}
 0x28f   :  { %s452_s17 = scalar_lea.hbm %s611_s6, 32 }
 0x290   :  { %p453_p1 = scmp.ne.s32.totalorder %s611_s6, %s452_s17  ;;  %p456_p2 = scmp.lt.u32.totalorder %s452_s17, %s611_s6 }
 0x292   :  { %p458_p3 = pnand %p456_p2, %p453_p1 }
 0x294   :  { %461 = shalt.err (!%p458_p3)
}
 0x295   :  { %300 = dma.vmem_to_hbm [thread:$0]  %s298_s4, 32, %s611_s6, [#allocation10]  }
 0x296   :  { %s503_s23 = smov [#allocation8]  }
 0x297   :  { %s287_s24 = sshll.u32 %s503_s23, 4  ;;  %s288_s24 = int_to_ptr.vmem [resolvable:$true] %s287_s24 }
 0x298   :  { %s462_s25 = scalar_lea.vmem %s288_s24, 32  ;;  %p467_p5 = scmp.lt.s32.totalorder %s288_s24, %s288_s24 }
 0x299   :  { %p463_p4 = scmp.ne.s32.totalorder %s288_s24, %s462_s25  ;;  %p468_p6 = scmp.lt.s32.totalorder %s462_s25, %s462_s25 }
 0x29b   :  { %p469_p7 = por %p468_p6, %p467_p5 }
 0x29d   :  { %p470_p8 = pnand %p469_p7, %p463_p4 }
 0x31a   :  { %v276_v14 = vpop.xlane.xlu0 %275 }
 0x31b   :  { %372 = vrcp.f32 %v276_v14 }
 0x325   :  { %v373_v15 = vpop.eup %372 }
 0x326   :  { %v278_v16 = vmul.f32 %v373_v15, %v371_v12 }
 0x328   :  { %279 = vst [vmem:[#allocation8] sm:$0x3] %v278_v16 }
 0x329   :  { %473 = shalt.err (!%p470_p8)
}
 0x32a   :  { %s474_s28 = scalar_lea.hbm %s610_s5, 32 }
 0x32b   :  { %p475_p9 = scmp.ne.s32.totalorder %s610_s5, %s474_s28  ;;  %p478_p10 = scmp.lt.u32.totalorder %s474_s28, %s610_s5 }
 0x32d   :  { %p480_p11 = pnand %p478_p10, %p475_p9 }
 0x32f   :  { %483 = shalt.err (!%p480_p11)
}
 0x330   :  { %290 = dma.vmem_to_hbm [thread:$0]  %s288_s24, 32, %s610_s5, [#allocation4]  }
 0x331   :  { %488 = dma.done.wait [#allocation4], 32  }
 0x332   :  { %489 = vsyncadd [#allocation4], 4294967264 }
 0x333   :  { %490 = dma.done.wait [#allocation10], 32  }
 0x334   :  { %491 = vsyncadd [#allocation10], 4294967264 }
 0x335   :  { %307 = vsyncpa [#allocation3], 1 }
 0x336   :  { %308 = vsyncpa [#allocation6], 1 }
 0x337   :  { %309 = vsyncpa [#allocation4], 1 }
 0x338   :  { %310 = vsyncpa [#allocation10], 1 }

</bundles_post_ra>
